<compile_context>
chip_gen: v7x
topology: tpu7x:2x2x1
jax: 0.10.0
libtpu: 0.0.40
codegen_flags: <defaults>
</compile_context>

<pallas_src>
import functools

import jax
import jax.numpy as jnp
from jax.experimental import pallas as pl
from jax.experimental.pallas import tpu as pltpu


# ----------------------------------------------------------------------------
# Pallas kernel: vectorized greedy NMS (torchvision semantics: suppress when
# IoU > thr) over score-sorted boxes + convert to xywh + keep-mask output.
# ----------------------------------------------------------------------------
def _nms_kernel(n_valid_ref, d_smem, d_vmem, out_ref, *, iou_thr, n_pad):
    # d_* rows: 0=score, 1=x1, 2=y1, 3=x2, 4=y2 (rounded xyxy); columns are
    # boxes in score-descending order, below-threshold boxes at the end.
    n_valid = n_valid_ref[0]

    score_v = d_vmem[0:1, :]
    x1_v = d_vmem[1:2, :]
    y1_v = d_vmem[2:3, :]
    x2_v = d_vmem[3:4, :]
    y2_v = d_vmem[4:5, :]
    area_v = (x2_v - x1_v) * (y2_v - y1_v)          # precomputed once (hoisted)

    col = jax.lax.broadcasted_iota(jnp.int32, (1, n_pad), 1)
    keep0 = (col < n_valid).astype(jnp.float32)      # vector keep-mask init

    def body(i, keep_v):
        # Box i scalars: cheap SMEM loads, broadcast into the vector math.
        xi1 = d_smem[1, i]
        yi1 = d_smem[2, i]
        xi2 = d_smem[3, i]
        yi2 = d_smem[4, i]
        area_i = (xi2 - xi1) * (yi2 - yi1)

        # One VPU pass over all candidate boxes j.
        iw = jnp.maximum(jnp.minimum(x2_v, xi2) - jnp.maximum(x1_v, xi1), 0.0)
        ih = jnp.maximum(jnp.minimum(y2_v, yi2) - jnp.maximum(y1_v, yi1), 0.0)
        inter = iw * ih
        union = area_v + area_i - inter
        # Divide-free IoU > thr test; the `union > 0` guard keeps degenerate
        # (non-positive-area) boxes un-suppressed, matching the divide form.
        overlap = (inter > iou_thr * union) & (union > 0.0)

        # keep[i] via one-hot select + cross-lane reduce (XLU) — a suppressed
        # box must not suppress later boxes; no scalar VMEM reads.
        keep_i = jnp.max(jnp.where(col == i, keep_v, 0.0), axis=1,
                         keepdims=True)
        kill = jnp.where(overlap & (col > i), keep_i, 0.0)
        return keep_v * (1.0 - kill)

    keep = jax.lax.fori_loop(0, n_valid, body, keep0)

    # Lane-dense, fully-initialized output:
    # rows 0..4 = [score, x, y, w, h] (convert_batch_to_xywh) masked by keep,
    # row 5 = keep mask, rows 6..7 = zeros.
    out_ref[0:1, :] = score_v * keep
    out_ref[1:2, :] = x1_v * keep
    out_ref[2:3, :] = y1_v * keep
    out_ref[3:4, :] = (x2_v - x1_v) * keep
    out_ref[4:5, :] = (y2_v - y1_v) * keep
    out_ref[5:6, :] = keep
    out_ref[6:8, :] = jnp.zeros((2, n_pad), jnp.float32)


# ----------------------------------------------------------------------------
# Forward: scale_batch_bbx_xywh + xyxy + round (lane-dense jnp, fuses), one
# argsort + one gather, Pallas NMS kernel, then compaction of kept boxes.
# ----------------------------------------------------------------------------
def _forward(x, *, prob_thr, iou_thr, x_patch, y_patch, width, height, P):
    N = P * P
    n_pad = ((N + 127) // 128) * 128

    xf = x.astype(jnp.float32).reshape(5, N)         # lane-dense flatten
    score = xf[0]
    valid = score > prob_thr
    n_valid = jnp.sum(valid, dtype=jnp.int32).reshape(1)

    idx = jnp.arange(N, dtype=jnp.int32)
    i_idx = (idx // P).astype(jnp.float32)            # patch row -> scales x
    j_idx = (idx % P).astype(jnp.float32)             # patch col -> scales y

    # scale_batch_bbx_xywh: only above-threshold cells are rewritten.
    x1 = jnp.where(valid, xf[1] * x_patch + i_idx * x_patch, xf[1])
    y1 = jnp.where(valid, xf[2] * y_patch + j_idx * y_patch, xf[2])
    w = jnp.where(valid, xf[3] * width, xf[3])
    h = jnp.where(valid, xf[4] * height, xf[4])

    # convert_batch_to_xyxy + torch.round on coordinates (scores unrounded).
    bx1 = jnp.round(x1)
    by1 = jnp.round(y1)
    bx2 = jnp.round(x1 + w)
    by2 = jnp.round(y1 + h)

    # Sort valid-first, score-descending. Stable sort (torch.sort is not
    # guaranteed stable; results may differ only on exact score ties).
    sort_key = jnp.where(valid, -score, jnp.inf)
    order = jnp.argsort(sort_key, stable=True)

    stacked = jnp.stack([score, bx1, by1, bx2, by2], axis=0)   # (5, N)
    data = jnp.take(stacked, order, axis=1)                    # one gather
    data = jnp.pad(data, ((0, 3), (0, n_pad - N)))             # (8, n_pad)

    out8 = pl.pallas_call(
        functools.partial(_nms_kernel, iou_thr=iou_thr, n_pad=n_pad),
        in_specs=[
            pl.BlockSpec(memory_space=pltpu.MemorySpace.SMEM),   # n_valid
            pl.BlockSpec(memory_space=pltpu.MemorySpace.SMEM),   # scalar view
            pl.BlockSpec(memory_space=pltpu.MemorySpace.VMEM),   # vector view
        ],
        out_specs=pl.BlockSpec(memory_space=pltpu.MemorySpace.VMEM),
        out_shape=jax.ShapeDtypeStruct((8, n_pad), jnp.float32),
    )(n_valid, data, data)

    keep = out8[5, :N]                                 # exact 0.0 / 1.0
    num_kept = jnp.sum(keep).astype(jnp.int32)
    # Stable partition kept-first (kept boxes are already score-descending);
    # non-kept columns are zero, so rows >= num_kept come out exactly zero.
    perm = jnp.argsort(-keep, stable=True)
    out = jnp.take(out8[:5, :N], perm, axis=1).T       # (N, 5)
    return out, num_kept


class ReduceBoundingBoxesPallas:
    # TODO(synk): PyTorch returns a dynamically-shaped (K, 5) tensor (or (0, 5));
    # JAX needs static shapes, so we return a padded (N, 5) array with the kept
    # boxes compacted to the front (score-descending) plus the kept-box count.

    def __init__(self, probability_threshold=0.9, iou_threshold=0.5,
                 input_shape=(3, 320, 240), num_of_patches=40):
        _, width, height = input_shape
        self.num_of_patches = int(num_of_patches)
        self._fn = jax.jit(functools.partial(
            _forward,
            prob_thr=float(probability_threshold),
            iou_thr=float(iou_threshold),
            x_patch=float(width) / num_of_patches,
            y_patch=float(height) / num_of_patches,
            width=float(width),
            height=float(height),
            P=int(num_of_patches),
        ))

    def __call__(self, x):
        return self._fn(x)


if __name__ == "__main__":
    P = 16  # small patch grid; N = 256 candidate cells
    module = ReduceBoundingBoxesPallas(
        probability_threshold=0.9,
        iou_threshold=0.5,
        input_shape=(3, 320, 240),
        num_of_patches=P,
    )

    key = jax.random.PRNGKey(0)
    k_score, k_box = jax.random.split(key)
    scores = jax.random.uniform(k_score, (1, P, P), dtype=jnp.float32)
    coords = jax.random.uniform(k_box, (4, P, P), dtype=jnp.float32)
    x = jnp.concatenate([scores, coords], axis=0)  # (5, P, P)

    out, num_kept = module(x)
    jax.block_until_ready((out, num_kept))
    print("KERNEL_OK")
</pallas_src>

<mosaic_0001>
module attributes {stable_mosaic.version = 11 : i64} {
  func.func @_nms_kernel(%arg0: memref<1xi32, #tpu.memory_space<smem>>, %arg1: memref<8x256xf32, #tpu.memory_space<smem>>, %arg2: memref<8x256xf32, #tpu.memory_space<vmem>>, %arg3: memref<8x256xf32, #tpu.memory_space<vmem>>) attributes {dimension_semantics = [], scalar_prefetch = 0 : i64, scratch_operands = 0 : i64, tpu.core_type = #tpu.core_type<tc>} {
    %c0 = arith.constant 0 : index
    %0 = memref.load %arg0[%c0] : memref<1xi32, #tpu.memory_space<smem>>
    %c0_0 = arith.constant 0 : index
    %c0_1 = arith.constant 0 : index
    %1 = vector.load %arg2[%c0_0, %c0_1] : memref<8x256xf32, #tpu.memory_space<vmem>>, vector<1x256xf32>
    %c1 = arith.constant 1 : index
    %c0_2 = arith.constant 0 : index
    %2 = vector.load %arg2[%c1, %c0_2] : memref<8x256xf32, #tpu.memory_space<vmem>>, vector<1x256xf32>
    %c2 = arith.constant 2 : index
    %c0_3 = arith.constant 0 : index
    %3 = vector.load %arg2[%c2, %c0_3] : memref<8x256xf32, #tpu.memory_space<vmem>>, vector<1x256xf32>
    %c3 = arith.constant 3 : index
    %c0_4 = arith.constant 0 : index
    %4 = vector.load %arg2[%c3, %c0_4] : memref<8x256xf32, #tpu.memory_space<vmem>>, vector<1x256xf32>
    %c4 = arith.constant 4 : index
    %c0_5 = arith.constant 0 : index
    %5 = vector.load %arg2[%c4, %c0_5] : memref<8x256xf32, #tpu.memory_space<vmem>>, vector<1x256xf32>
    %6 = arith.subf %4, %2 : vector<1x256xf32>
    %7 = arith.subf %5, %3 : vector<1x256xf32>
    %8 = arith.mulf %6, %7 : vector<1x256xf32>
    %9 = tpu.iota {dimensions = array<i32: 1>} : vector<1x256xi32>
    %10 = vector.broadcast %0 : i32 to vector<1x256xi32>
    %11 = arith.cmpi slt, %9, %10 : vector<1x256xi32>
    %12 = arith.extui %11 : vector<1x256xi1> to vector<1x256xi32>
    %13 = arith.sitofp %12 : vector<1x256xi32> to vector<1x256xf32>
    %c0_i32 = arith.constant 0 : i32
    %14 = arith.subi %0, %c0_i32 : i32
    %15 = arith.addi %c0_i32, %14 : i32
    %c1_i32 = arith.constant 1 : i32
    %16 = scf.for %arg4 = %c0_i32 to %15 step %c1_i32 iter_args(%arg5 = %13) -> (vector<1x256xf32>)  : i32 {
      %c1_18 = arith.constant 1 : index
      %32 = arith.index_cast %arg4 : i32 to index
      %33 = memref.load %arg1[%c1_18, %32] : memref<8x256xf32, #tpu.memory_space<smem>>
      %c2_19 = arith.constant 2 : index
      %34 = arith.index_cast %arg4 : i32 to index
      %35 = memref.load %arg1[%c2_19, %34] : memref<8x256xf32, #tpu.memory_space<smem>>
      %c3_20 = arith.constant 3 : index
      %36 = arith.index_cast %arg4 : i32 to index
      %37 = memref.load %arg1[%c3_20, %36] : memref<8x256xf32, #tpu.memory_space<smem>>
      %c4_21 = arith.constant 4 : index
      %38 = arith.index_cast %arg4 : i32 to index
      %39 = memref.load %arg1[%c4_21, %38] : memref<8x256xf32, #tpu.memory_space<smem>>
      %40 = arith.subf %37, %33 : f32
      %41 = arith.subf %39, %35 : f32
      %42 = arith.mulf %40, %41 : f32
      %43 = vector.broadcast %37 : f32 to vector<1x256xf32>
      %44 = arith.minimumf %4, %43 : vector<1x256xf32>
      %45 = vector.broadcast %33 : f32 to vector<1x256xf32>
      %46 = arith.maximumf %2, %45 : vector<1x256xf32>
      %47 = arith.subf %44, %46 : vector<1x256xf32>
      %cst_22 = arith.constant 0.000000e+00 : f32
      %48 = vector.broadcast %cst_22 : f32 to vector<1x256xf32>
      %49 = arith.maximumf %47, %48 : vector<1x256xf32>
      %50 = vector.broadcast %39 : f32 to vector<1x256xf32>
      %51 = arith.minimumf %5, %50 : vector<1x256xf32>
      %52 = vector.broadcast %35 : f32 to vector<1x256xf32>
      %53 = arith.maximumf %3, %52 : vector<1x256xf32>
      %54 = arith.subf %51, %53 : vector<1x256xf32>
      %cst_23 = arith.constant 0.000000e+00 : f32
      %55 = vector.broadcast %cst_23 : f32 to vector<1x256xf32>
      %56 = arith.maximumf %54, %55 : vector<1x256xf32>
      %57 = arith.mulf %49, %56 : vector<1x256xf32>
      %58 = vector.broadcast %42 : f32 to vector<1x256xf32>
      %59 = arith.addf %8, %58 : vector<1x256xf32>
      %60 = arith.subf %59, %57 : vector<1x256xf32>
      %cst_24 = arith.constant 5.000000e-01 : f32
      %61 = vector.broadcast %cst_24 : f32 to vector<1x256xf32>
      %62 = arith.mulf %61, %60 : vector<1x256xf32>
      %63 = arith.cmpf ogt, %57, %62 : vector<1x256xf32>
      %cst_25 = arith.constant 0.000000e+00 : f32
      %64 = vector.broadcast %cst_25 : f32 to vector<1x256xf32>
      %65 = arith.cmpf ogt, %60, %64 : vector<1x256xf32>
      %66 = arith.andi %63, %65 : vector<1x256xi1>
      %67 = vector.broadcast %arg4 : i32 to vector<1x256xi32>
      %68 = arith.cmpi eq, %9, %67 : vector<1x256xi32>
      %cst_26 = arith.constant 0.000000e+00 : f32
      %69 = vector.broadcast %cst_26 : f32 to vector<1x256xf32>
      %70 = arith.select %68, %arg5, %69 : vector<1x256xi1>, vector<1x256xf32>
      %cst_27 = arith.constant dense<0xFF800000> : vector<1xf32>
      %71 = vector.multi_reduction <maximumf>, %70, %cst_27 [1] : vector<1x256xf32> to vector<1xf32>
      %72 = vector.shape_cast %71 : vector<1xf32> to vector<1x1xf32>
      %73 = vector.broadcast %arg4 : i32 to vector<1x256xi32>
      %74 = arith.cmpi sgt, %9, %73 : vector<1x256xi32>
      %75 = arith.andi %66, %74 : vector<1x256xi1>
      %cst_28 = arith.constant 0.000000e+00 : f32
      %76 = vector.shape_cast %72 : vector<1x1xf32> to vector<1x1xf32>
      %77 = vector.broadcast %76 : vector<1x1xf32> to vector<1x256xf32>
      %78 = vector.broadcast %cst_28 : f32 to vector<1x256xf32>
      %79 = arith.select %75, %77, %78 : vector<1x256xi1>, vector<1x256xf32>
      %cst_29 = arith.constant 1.000000e+00 : f32
      %80 = vector.broadcast %cst_29 : f32 to vector<1x256xf32>
      %81 = arith.subf %80, %79 : vector<1x256xf32>
      %82 = arith.mulf %arg5, %81 : vector<1x256xf32>
      scf.yield %82 : vector<1x256xf32>
    }
    %17 = arith.mulf %1, %16 : vector<1x256xf32>
    %c0_6 = arith.constant 0 : index
    %c0_7 = arith.constant 0 : index
    %18 = vector.load %arg3[%c0_6, %c0_7] : memref<8x256xf32, #tpu.memory_space<vmem>>, vector<1x256xf32>
    tpu.vector_store %arg3[%c0_6, %c0_7], %17 {strides = array<i32>} : memref<8x256xf32, #tpu.memory_space<vmem>>, vector<1x256xf32>,
    %19 = arith.mulf %2, %16 : vector<1x256xf32>
    %c1_8 = arith.constant 1 : index
    %c0_9 = arith.constant 0 : index
    %20 = vector.load %arg3[%c1_8, %c0_9] : memref<8x256xf32, #tpu.memory_space<vmem>>, vector<1x256xf32>
    tpu.vector_store %arg3[%c1_8, %c0_9], %19 {strides = array<i32>} : memref<8x256xf32, #tpu.memory_space<vmem>>, vector<1x256xf32>,
    %21 = arith.mulf %3, %16 : vector<1x256xf32>
    %c2_10 = arith.constant 2 : index
    %c0_11 = arith.constant 0 : index
    %22 = vector.load %arg3[%c2_10, %c0_11] : memref<8x256xf32, #tpu.memory_space<vmem>>, vector<1x256xf32>
    tpu.vector_store %arg3[%c2_10, %c0_11], %21 {strides = array<i32>} : memref<8x256xf32, #tpu.memory_space<vmem>>, vector<1x256xf32>,
    %23 = arith.subf %4, %2 : vector<1x256xf32>
    %24 = arith.mulf %23, %16 : vector<1x256xf32>
    %c3_12 = arith.constant 3 : index
    %c0_13 = arith.constant 0 : index
    %25 = vector.load %arg3[%c3_12, %c0_13] : memref<8x256xf32, #tpu.memory_space<vmem>>, vector<1x256xf32>
    tpu.vector_store %arg3[%c3_12, %c0_13], %24 {strides = array<i32>} : memref<8x256xf32, #tpu.memory_space<vmem>>, vector<1x256xf32>,
    %26 = arith.subf %5, %3 : vector<1x256xf32>
    %27 = arith.mulf %26, %16 : vector<1x256xf32>
    %c4_14 = arith.constant 4 : index
    %c0_15 = arith.constant 0 : index
    %28 = vector.load %arg3[%c4_14, %c0_15] : memref<8x256xf32, #tpu.memory_space<vmem>>, vector<1x256xf32>
    tpu.vector_store %arg3[%c4_14, %c0_15], %27 {strides = array<i32>} : memref<8x256xf32, #tpu.memory_space<vmem>>, vector<1x256xf32>,
    %c5 = arith.constant 5 : index
    %c0_16 = arith.constant 0 : index
    %29 = vector.load %arg3[%c5, %c0_16] : memref<8x256xf32, #tpu.memory_space<vmem>>, vector<1x256xf32>
    tpu.vector_store %arg3[%c5, %c0_16], %16 {strides = array<i32>} : memref<8x256xf32, #tpu.memory_space<vmem>>, vector<1x256xf32>,
    %cst = arith.constant 0.000000e+00 : f32
    %30 = vector.broadcast %cst : f32 to vector<2x256xf32>
    %c6 = arith.constant 6 : index
    %c0_17 = arith.constant 0 : index
    %31 = vector.load %arg3[%c6, %c0_17] : memref<8x256xf32, #tpu.memory_space<vmem>>, vector<2x256xf32>
    tpu.vector_store %arg3[%c6, %c0_17], %30 {strides = array<i32>} : memref<8x256xf32, #tpu.memory_space<vmem>>, vector<2x256xf32>,
    return
  }
}

</mosaic_0001>

<bundles_post_ra>
// kernel: _forward.1
= control target key start
LH: loop header
LB: loop body
LE: loop exit
PB: predicated region body
PF: predicated region fallthrough
CT: control target
= control target key end

     0   :  { %9 = vsyncpa [#allocation4], 0  ;;  %s500_s0 = inlined_call_operand.<no memory space> [shape: s32[1], index: 0, kind: input, shape index: {}]   ;;  %s501_s1 = inlined_call_operand.vmem [shape: f32[8,256], index: 1, kind: input, shape index: {}, may-alias: {1,2}]   ;;  %s502_s2 = inlined_call_operand.vmem [shape: f32[8,256], index: 2, kind: input, shape index: {}, may-alias: {1,2}]   ;;  %s503_s3 = inlined_call_operand.vmem [shape: f32[8,256], index: 3, kind: output, shape index: {}]  }
   0x1   :  { %s18_s14 = sshll.u32 %s501_s1, 4  ;;  %s19_s14 = int_to_ptr.vmem [resolvable:$true] %s18_s14 }
   0x2   :  { %s272_s15 = scalar_lea.vmem %s19_s14, 256  ;;  %p277_p1 = scmp.lt.s32.totalorder %s19_s14, %s19_s14 }
   0x3   :  { %p273_p0 = scmp.ne.s32.totalorder %s19_s14, %s272_s15  ;;  %p278_p2 = scmp.lt.s32.totalorder %s272_s15, %s272_s15 }
   0x5   :  { %p279_p3 = por %p278_p2, %p277_p1 }
   0x7   :  { %p280_p4 = pnand %p279_p3, %p273_p0 }
   0x9   :  { %283 = shalt.err (!%p280_p4)
}
   0xa   :  { %s326_s16 = smov [#allocation3]  }
   0xb   :  { %21 = dma.vmem_to_smem %s19_s14, 256, %s326_s16, [#allocation4]  }
   0xc   :  { %304 = dma.done.wait [#allocation4], 256  }
   0xd   :  { %305 = vsyncadd [#allocation4], 4294967040 }
   0xe   :  { %27 = sfence }
   0xf   :  { %v357_v0 = vld [vmem:[%s502_s2] ss:$8 sm:$0x3]  ;;  %v362_v1 = vld [vmem:[%s502_s2 + $0x1] ss:$8 sm:$0x3]  ;;  %v41_v2 = vlaneseq  ;;  %v44_v5 = vstv %s500_s0 }
  0x10   :  { %v367_v3 = vld [vmem:[%s502_s2 + $0x2] ss:$8 sm:$0x3]  ;;  %v372_v4 = vld [vmem:[%s502_s2 + $0x3] ss:$8 sm:$0x3] }
  0x11   :  { %v380_v6 = vld [vmem:[%s502_s2 + $0x4] ss:$8 sm:$0x3]  ;;  %v384_v7 = vsub.f32 %v372_v4, %v362_v1  ;;  %v387_v8 = vand.u32 127, %v41_v2  ;;  %v327_v12 = vmov 0.0   ;;  %p220_p5 = scmp.le.s32.totalorder %s500_s0, 0 }
  0x12   :  { %v391_v9 = vsub.f32 %v380_v6, %v367_v3  ;;  %s415_s29 = smov (!%p220_p5), 0  }
  0x13   :  { %v394_v10 = vadd.s32 128, %v387_v8  ;;  %vm45_vm0 = vcmp.lt.s32.totalorder %v387_v8, %v44_v5  ;;  %207 = sbr.rel (%p220_p5) target bundleno = 184 (0xb8), region = 46 }
  0x14   :  { %v399_v11 = vmul.f32 %v391_v9, %v384_v7  ;;  %v218_v13 = vsel %vm45_vm0, 1.0, %v327_v12  }
  0x15   :  { %vm46_vm1 = vcmp.lt.s32.totalorder %v394_v10, %v44_v5  ;;  %v505_v16 = vmov %v218_v13 }
  0x16   :  { %v219_v14 = vsel %vm46_vm1, 1.0, %v327_v12  }
  0x17   :  { %v504_v15 = vmov %v219_v14 }
  0x1a LB: > { %s59_s30 = sshra.s32 %s316_s29, 7  ;;  %s63_s4 = sand.u32 127, %s316_s29  ;;  %v99_v17 = vstv %s316_s29  ;;  %vm104_vm2 = vcmask 1040384   ;;  %v328_v25 = vmov 1966171168   ;;  %v329_v32 = vmov 0   ;;  %s316_s29 = sphi %s415_s29, %s54_s29   ;;  %v312_v13 = vphi %v218_v13, %v507_v13   ;;  %v308_v14 = vphi %v219_v14, %v506_v14  }
  0x1b   : > { %s221_s5 = sshll.u32 %s59_s30, 10  ;;  %s64_s6 = sadd.s32 128, %s63_s4  ;;  %vm100_vm3 = vcmp.eq.s32.totalorder %v387_v8, %v99_v17  ;;  %vm101_vm4 = vcmp.eq.s32.totalorder %v394_v10, %v99_v17  ;;  %v116_v26 = vunpack.c.l.s4 %v328_v25  ;;  %vm110_vm5 = vcmp.gt.s32.totalorder %v387_v8, %v99_v17 }
  0x1c   : > { %s65_s7 = sadd.s32 %s221_s5, %s64_s6  ;;  %s67_s8 = sadd.s32 256, %s63_s4  ;;  %v102_v18 = vsel %vm100_vm3, %v312_v13, 0.0  ;;  %v103_v19 = vsel %vm101_vm4, %v308_v14, 0.0  ;;  %vm111_vm6 = vcmp.gt.s32.totalorder %v394_v10, %v99_v17  ;;  %v112_v33 = vsel %vm110_vm5, 1, %v329_v32 }
  0x1d   : > { %s433_s9 = sld [smem:[#allocation3 + %s65_s7]]  ;;  %s68_s10 = sadd.s32 %s221_s5, %s67_s8  ;;  %v105_v20 = vsel %vm104_vm2, %v102_v18, -inf  ;;  %v106_v21 = vsel %vm104_vm2, %v103_v19, -inf  ;;  %v113_v34 = vsel %vm111_vm6, 1, %v329_v32  ;;  %v117_v37 = vunpack.c.0.s8 %v116_v26 }
  0x1e   : > { %s435_s11 = sld [smem:[#allocation3 + %s68_s10]]  ;;  %s70_s12 = sadd.s32 384, %s63_s4  ;;  %v107_v22 = vmax.f32 %v105_v20, %v106_v21  ;;  %v114_v36 = vcombine.low %v112_v33, %v113_v34  ;;  %v119_v38 = vshrl.u32 %v41_v2, 7 }
  0x1f   : > { %s71_s13 = sadd.s32 %s221_s5, %s70_s12  ;;  %s73_s14 = sadd.s32 512, %s63_s4 }
  0x20   : > { %s72_s15 = sld [smem:[#allocation3 + %s71_s13]]  ;;  %s74_s16 = sadd.s32 %s221_s5, %s73_s14  ;;  %108 = vmax.xlane.f32.xlu0 %v107_v22  ;;  %v120_v41 = vsub.s32 %v117_v37, %v119_v38  ;;  %v134_v51 = vsub.s32 0, %v119_v38  ;;  %v146_v54 = vsub.s32 1, %v119_v38 }
  0x21   : > { %s75_s17 = sld [smem:[#allocation3 + %s74_s16]]  ;;  %s54_s29 = sadd.s32 1, %s316_s29  }
  0x22   : > { %v121_v46 = vrot.slane %v114_v36, %v120_v41  ;;  %p53_p6 = scmp.ge.s32.totalorder %s54_s29, %s500_s0 }
  0x23   : > { %v81_v23 = vstv %s433_s9 }
  0x24   : > { %v87_v24 = vstv %s435_s11  ;;  %v82_v27 = vmax.f32 %v362_v1, %v81_v23  ;;  %v128_v48 = vrot.slane %v121_v46, %v120_v41 }
  0x25   : > { %v88_v28 = vmax.f32 %v367_v3, %v87_v24 }
  0x26   : > { %s76_s18 = ssub.f32 %s72_s15, %s433_s9  ;;  %v79_v29 = vstv %s72_s15  ;;  %vm129_vm8 = vcmp.ne.s32.totalorder %v128_v48, 0 }
  0x27   : > { %s77_s19 = ssub.f32 %s75_s17, %s435_s11  ;;  %v80_v30 = vmin.f32 %v372_v4, %v79_v29  ;;  %v85_v31 = vstv %s75_s17 }
  0x28   : > { %v86_v35 = vmin.f32 %v380_v6, %v85_v31 }
  0x29   : > { %s78_s1 = smul.f32 %s77_s19, %s76_s18  ;;  %v83_v39 = vsub.f32 %v80_v30, %v82_v27 }
  0x2a   : > { %v89_v40 = vsub.f32 %v86_v35, %v88_v28 }
  0x2b   : > { %v84_v42 = vmax.f32 %v83_v39, 0.0  ;;  %v92_v43 = vstv %s78_s1 }
  0x2c   : > { %v90_v44 = vmax.f32 %v89_v40, 0.0  ;;  %v93_v45 = vadd.f32 %v92_v43, %v399_v11 }
  0x2e   : > { %v91_v47 = vmul.f32 %v90_v44, %v84_v42 }
  0x30   : > { %v94_v49 = vsub.f32 %v93_v45, %v91_v47 }
  0x32   : > { %v95_v50 = vmul.f32 0.5, %v94_v49  ;;  %vm97_vm7 = vcmp.gt.f32.partialorder %v94_v49, 0.0 }
  0x34   : > { %vm96_vm9 = vcmp.gt.f32.partialorder %v91_v47, %v95_v50 }
  0x35   : > { %vm98_vm10 = vmand %vm96_vm9, %vm97_vm7 }
  0x36   : > { %vm130_vm11 = vmand %vm98_vm10, %vm129_vm8 }
  0xad   : > { %v109_v52 = vpop.xlane.xlu0 %108 }
  0xae   : > { %v135_v53 = vrot.slane %v109_v52, %v134_v51 }
  0xb0   : > { %v137_v55 = vsel %vm130_vm11, %v135_v53, 0.0 }
  0xb1   : > { %v138_v56 = vsub.f32 1.0, %v137_v55  ;;  %56 = sbr.rel (!%p53_p6) target bundleno = 26 (0x1a), region = 52 }
  0xb3   : > { %v143_v57 = vrot.slane %v138_v56, %v134_v51  ;;  %v147_v58 = vrot.slane %v138_v56, %v146_v54 }
  0xb5   : > { %v150_v59 = vmul.f32 %v312_v13, %v143_v57   ;;  %v151_v60 = vmul.f32 %v308_v14, %v147_v58  }
  0xb7   : > { %v506_v14 = vmov %v151_v60  ;;  %v507_v13 = vmov %v150_v59  ;;  %v508_v15 = vmov (%p53_p6), %v151_v60  ;;  %v509_v16 = vmov (%p53_p6), %v150_v59 }
  0xb8 PF:  { %196 = vst [vmem:[%s503_s3] sm:$0xc0] %v327_v12  ;;  %197 = vst [vmem:[%s503_s3 + $0x8] sm:$0xc0] %v327_v12  ;;  %v330_v61 = vmov 1966171168   ;;  %v159_v63 = vshrl.u32 %v41_v2, 7  ;;  %v154_v4 = vcombine.low %v324_v16, %v320_v15  ;;  %v324_v16 = vphi %v505_v16, %v509_v16   ;;  %v320_v15 = vphi %v504_v15, %v508_v15  }
  0xb9   :  { %v156_v62 = vunpack.c.l.s4 %v330_v61  ;;  %vm173_vm12 = vcmp.lt.s32.totalorder %v41_v2, 256 }
  0xbb   :  { %v157_v5 = vunpack.c.0.s8 %v156_v62 }
  0xbd   :  { %v160_v6 = vsub.s32 %v157_v5, %v159_v63 }
  0xbf   :  { %v161_v8 = vrot.slane %v154_v4, %v160_v6 }
  0xc1   :  { %v168_v10 = vrot.slane %v161_v8, %v160_v6 }
  0xc3   :  { %v170_v11 = vmul.f32 %v168_v10, %v357_v0  ;;  %226 = vst.msk [vmem:[%s503_s3 + $0x5] ss:$8 sm:$0x3] %vm173_vm12, %v168_v10  ;;  %v177_v13 = vmul.f32 %v362_v1, %v168_v10  ;;  %v181_v12 = vmul.f32 %v367_v3, %v168_v10  ;;  %v185_v14 = vmul.f32 %v168_v10, %v384_v7 }
  0xc4   :  { %v189_v15 = vmul.f32 %v168_v10, %v391_v9 }
  0xc5   :  { %175 = vst.msk [vmem:[%s503_s3] ss:$8 sm:$0x3] %vm173_vm12, %v170_v11  ;;  %222 = vst.msk [vmem:[%s503_s3 + $0x1] ss:$8 sm:$0x3] %vm173_vm12, %v177_v13 }
  0xc6   :  { %223 = vst.msk [vmem:[%s503_s3 + $0x2] ss:$8 sm:$0x3] %vm173_vm12, %v181_v12  ;;  %224 = vst.msk [vmem:[%s503_s3 + $0x3] ss:$8 sm:$0x3] %vm173_vm12, %v185_v14 }
  0xc7   :  { %225 = vst.msk [vmem:[%s503_s3 + $0x4] ss:$8 sm:$0x3] %vm173_vm12, %v189_v15 }
  0xc8   :  { %202 = vsyncpa [#allocation4], 1 }

</bundles_post_ra>
